<compile_context>
chip_gen: v5e
topology: v5e:2x2
jax: 0.10.0
libtpu: 0.0.40
codegen_flags: <defaults>
</compile_context>

<pallas_src>
import functools

import numpy as np

import jax
import jax.numpy as jnp
from jax.experimental import pallas as pl
from jax.experimental.pallas import tpu as pltpu

_SUBLANE = 8
_LANE = 128


def _round_up(v, m):
    return (v + m - 1) // m * m


def _vmem_budget():
    """Generation-aware usable-VMEM cap (leaves headroom for Mosaic scratch)."""
    try:
        cap = int(pltpu.get_tpu_info().vmem_capacity_bytes)
    except Exception:
        cap = 64 << 20  # conservative fallback (v7x per-TC physical VMEM)
    # ~80%: ~100 MiB on 128 MiB chips (v5e/v6e), ~51 MiB on 64 MiB (v7x).
    return int(cap * 0.8)


def _footprint(tm, tf, D, cdt_bytes, out_bytes, use_acc_scratch):
    """Rough VMEM bytes for one grid step (double-buffered pipeline tiles)."""
    b = 2 * tm * D * cdt_bytes            # x tiles
    b += 2 * tm * D * out_bytes           # out tiles
    b += 2 * D * tf * cdt_bytes           # W1 tiles
    b += 2 * tf * D * cdt_bytes           # W2 tiles
    b += 2 * (tf + 2 * D) * 4             # b1, b2, gamma (f32)
    if use_acc_scratch:
        b += tm * D * 4                   # f32 accumulator scratch
    b += tm * tf * (4 + cdt_bytes)        # h (f32) + its cast copy for matmul 2
    b += 2 * tm * D * 4                   # contrib / final f32 staging
    return b


def _choose_tiles(tokens, D, F, cdt_bytes, out_bytes, budget, max_tm, max_tf):
    """Pick (tm, tf, use_acc_scratch); prefer a fully weight-resident F axis."""
    tm_cap = _round_up(tokens, _SUBLANE)
    f_full = _round_up(F, _LANE)

    if max_tm is not None or max_tf is not None:     # explicit override (tests)
        tm_e = min(_round_up(max_tm or 1024, _SUBLANE), tm_cap, 1024)
        tf_e = min(_round_up(max_tf or f_full, _LANE), f_full)
        return tm_e, tf_e, (tf_e < f_full and out_bytes != 4)

    tf_cands = [f_full] + [t for t in (2048, 1024, 512, 256, 128) if t < f_full]
    tm_cands = [1024, 512, 256, 128, 64, 32, 16, 8]
    for tf in tf_cands:
        use_acc = (tf < f_full) and (out_bytes != 4)
        for tm in tm_cands:
            tm_e = min(tm, tm_cap)
            if _footprint(tm_e, tf, D, cdt_bytes, out_bytes, use_acc) <= budget:
                return tm_e, tf, use_acc
    # TODO(synk): for very large D (>= 4096 on v7x) add a D (output-N) tile axis
    # instead of falling back to the smallest row tile.
    tf_fb = _LANE if f_full > _LANE else f_full
    return min(8, tm_cap), tf_fb, (tf_fb < f_full and out_bytes != 4)


def _ffn_kernel(x_ref, w1_ref, b1_ref, w2_ref, b2_ref, g_ref, o_ref, *scratch,
                single_f, add_identity):
    # x_ref:  (tm, D)  compute dtype        w1_ref: (D, tf)  compute dtype
    # b1_ref: (1, tf)  f32                  w2_ref: (tf, D)  compute dtype
    # b2_ref: (1, D)   f32                  g_ref:  (1, D)   f32 (LayerScale)
    # o_ref:  (tm, D)  out dtype            scratch: optional (tm, D) f32 acc
    x = x_ref[...]
    h = jnp.dot(x, w1_ref[...], preferred_element_type=jnp.float32)
    h = jnp.maximum(h + b1_ref[...], 0.0)                       # bias + ReLU (f32)
    contrib = jnp.dot(h.astype(w2_ref.dtype), w2_ref[...],
                      preferred_element_type=jnp.float32)

    def _finalize(total_f32):
        out = (total_f32 + b2_ref[...]) * g_ref[...]            # gamma2 (LayerScale)
        if add_identity:
            out = out + x.astype(jnp.float32)                   # identity connection
        o_ref[...] = out.astype(o_ref.dtype)

    if single_f:
        # Weight-resident path: the whole F dimension is in one block.
        _finalize(contrib)
    else:
        # Streamed-F path: accumulate partial contributions over the F axis.
        # If the output dtype is f32 we accumulate directly into the resident
        # o_ref block; otherwise a f32 VMEM scratch accumulator is used.
        acc_ref = scratch[0] if scratch else o_ref
        f = pl.program_id(1)
        nf = pl.num_programs(1)

        @pl.when(f == 0)
        def _():
            acc_ref[...] = contrib.astype(acc_ref.dtype)

        @pl.when(jnp.logical_and(f > 0, f < nf - 1))
        def _():
            acc_ref[...] += contrib.astype(acc_ref.dtype)

        @pl.when(f == nf - 1)
        def _():
            _finalize(acc_ref[...].astype(jnp.float32) + contrib)


@functools.partial(jax.jit,
                   static_argnames=("add_identity", "compute_dtype",
                                    "max_tm", "max_tf"))
def ffn_pallas(x, w1, b1, w2, b2, gamma=None, *, add_identity=True,
               compute_dtype=jnp.bfloat16, max_tm=None, max_tf=None):
    """x: (B, N, D). w1: (D, F), b1: (1, F), w2: (F, D), b2: (1, D), gamma: (D,)."""
    B, N, D = x.shape
    F = w1.shape[1]
    tokens = B * N
    out_dtype = x.dtype

    cdt = compute_dtype
    cdt_bytes = np.dtype(cdt).itemsize
    out_bytes = np.dtype(out_dtype).itemsize

    budget = _vmem_budget()
    tm_eff, tf_eff, use_acc = _choose_tiles(
        tokens, D, F, cdt_bytes, out_bytes, int(budget * 0.9), max_tm, max_tf)

    f_p = _round_up(F, tf_eff)
    n_f = f_p // tf_eff
    single_f = (n_f == 1)
    use_acc = use_acc and not single_f

    tokens_p = _round_up(tokens, tm_eff)
    n_i = tokens_p // tm_eff
    # v7x shards the "parallel" token axis across its 2 TensorCores; when the
    # weights are resident (n_f == 1) splitting a single token block is free,
    # so make sure both cores get work.
    if single_f and n_i == 1 and tokens_p >= 2 * _SUBLANE:
        tm_eff = _round_up((tokens + 1) // 2, _SUBLANE)
        tokens_p = _round_up(tokens, tm_eff)
        n_i = tokens_p // tm_eff

    # --- operand preparation -------------------------------------------------
    x2 = x.reshape(tokens, D).astype(cdt)
    if tokens_p != tokens:
        # Padded rows produce garbage (relu(b1) @ W2 + b2 + 0) that is sliced
        # off below; this costs only wasted flops/writeback, never correctness.
        x2 = jnp.pad(x2, ((0, tokens_p - tokens), (0, 0)))

    w1c = w1.astype(cdt)
    w2c = w2.astype(cdt)
    b1f = b1.reshape(1, F).astype(jnp.float32)
    b2f = b2.reshape(1, D).astype(jnp.float32)
    if gamma is None:
        g = jnp.ones((1, D), jnp.float32)          # gamma2 = nn.Identity()
    else:
        g = gamma.reshape(1, D).astype(jnp.float32)
    if f_p != F:
        # Zero-padded F columns are exact no-ops: relu(x @ 0 + 0) = 0 and the
        # matching zero rows of W2 contribute nothing.
        w1c = jnp.pad(w1c, ((0, 0), (0, f_p - F)))
        b1f = jnp.pad(b1f, ((0, 0), (0, f_p - F)))
        w2c = jnp.pad(w2c, ((0, f_p - F), (0, 0)))

    # --- scheduler hints ------------------------------------------------------
    weight_passes = 1 if single_f else n_i          # resident vs re-streamed per i
    cost = pl.CostEstimate(
        flops=2 * 2 * tokens_p * D * f_p,
        transcendentals=0,
        bytes_accessed=int(tokens_p * D * cdt_bytes           # x in
                           + tokens_p * D * out_bytes         # out
                           + weight_passes * 2 * D * f_p * cdt_bytes  # W1 + W2
                           + f_p * 4 + 2 * D * 4),            # biases + gamma
    )

    scratch = [pltpu.VMEM((tm_eff, D), jnp.float32)] if use_acc else []
    kernel = functools.partial(_ffn_kernel, single_f=single_f,
                               add_identity=add_identity)

    out2 = pl.pallas_call(
        kernel,
        out_shape=jax.ShapeDtypeStruct((tokens_p, D), out_dtype),
        grid_spec=pltpu.PrefetchScalarGridSpec(
            num_scalar_prefetch=0,
            grid=(n_i, n_f),
            in_specs=[
                pl.BlockSpec((tm_eff, D), lambda i, f: (i, 0)),    # x tile
                pl.BlockSpec((D, tf_eff), lambda i, f: (0, f)),    # W1 F-chunk
                pl.BlockSpec((1, tf_eff), lambda i, f: (0, f)),    # b1 F-chunk
                pl.BlockSpec((tf_eff, D), lambda i, f: (f, 0)),    # W2 F-chunk
                pl.BlockSpec((1, D), lambda i, f: (0, 0)),         # b2
                pl.BlockSpec((1, D), lambda i, f: (0, 0)),         # gamma2
            ],
            out_specs=pl.BlockSpec((tm_eff, D), lambda i, f: (i, 0)),
            scratch_shapes=scratch,
        ),
        compiler_params=pltpu.CompilerParams(
            dimension_semantics=("parallel", "arbitrary"),
            vmem_limit_bytes=budget,
        ),
        cost_estimate=cost,
    )(x2, w1c, b1f, w2c, b2f, g)

    if tokens_p != tokens:
        out2 = out2[:tokens]
    return out2.reshape(B, N, D)


def _ffn_reference(x, w1, b1, w2, b2, gamma=None):
    h = jnp.maximum(x @ w1 + b1[0], 0.0)
    out = h @ w2 + b2[0]
    if gamma is not None:
        out = out * gamma
    return x + out


if __name__ == "__main__":
    # Small shapes consistent with the module: (B, N, embed_dims)
    B, N = 2, 8
    embed_dims = 128
    feedforward_channels = 256

    key = jax.random.PRNGKey(0)
    kx, k1, kb1, k2, kb2, kg = jax.random.split(key, 6)

    x = jax.random.normal(kx, (B, N, embed_dims), dtype=jnp.float32)
    # Deterministic synthetic parameters (nn.Linear weights stored as (in, out)).
    w1 = jax.random.normal(k1, (embed_dims, feedforward_channels), jnp.float32) * 0.02
    b1 = jax.random.normal(kb1, (1, feedforward_channels), jnp.float32) * 0.02
    w2 = jax.random.normal(k2, (feedforward_channels, embed_dims), jnp.float32) * 0.02
    b2 = jax.random.normal(kb2, (1, embed_dims), jnp.float32) * 0.02

    ref = _ffn_reference(x, w1, b1, w2, b2)

    # 1) Default path: weight-resident single F block, bf16 MXU inputs.
    out = jax.block_until_ready(ffn_pallas(x, w1, b1, w2, b2))
    assert out.shape == (B, N, embed_dims)
    assert jnp.allclose(out, ref, atol=2e-2, rtol=2e-2)

    # 2) Non-divisible token count (padding path): tokens = 2*7 = 14.
    x_odd = jax.random.normal(kx, (2, 7, embed_dims), dtype=jnp.float32)
    out_odd = jax.block_until_ready(ffn_pallas(x_odd, w1, b1, w2, b2))
    assert out_odd.shape == (2, 7, embed_dims)
    assert jnp.allclose(out_odd, _ffn_reference(x_odd, w1, b1, w2, b2),
                        atol=2e-2, rtol=2e-2)

    # 3) Force the streamed-F accumulation path (tf < F, accumulate into o_ref).
    out_f = jax.block_until_ready(
        ffn_pallas(x, w1, b1, w2, b2, max_tm=8, max_tf=128))
    assert jnp.allclose(out_f, ref, atol=2e-2, rtol=2e-2)

    # 4) f32-exact compute path (for callers that cannot tolerate bf16).
    out32 = jax.block_until_ready(
        ffn_pallas(x, w1, b1, w2, b2, compute_dtype=jnp.float32))
    assert jnp.allclose(out32, ref, atol=1e-4, rtol=1e-4)

    # 5) LayerScale (layer_scale_init_value > 0) path via gamma2.
    gamma = jnp.full((embed_dims,), 1e-5, jnp.float32) + \
        jax.random.normal(kg, (embed_dims,), jnp.float32) * 1e-6
    out_g = jax.block_until_ready(ffn_pallas(x, w1, b1, w2, b2, gamma))
    assert jnp.allclose(out_g, _ffn_reference(x, w1, b1, w2, b2, gamma),
                        atol=2e-2, rtol=2e-2)

    # TODO(synk): Dropout with ffn_drop > 0 and an explicit `identity` tensor
    # argument are not implemented (identity / defaults at the module config).
    print("KERNEL_OK")
</pallas_src>

<mosaic_0001>
module attributes {stable_mosaic.version = 11 : i64} {
  func.func @_ffn_kernel(%arg0: i32, %arg1: i32, %arg2: memref<8x128xbf16, #tpu.memory_space<vmem>>, %arg3: memref<128x256xbf16, #tpu.memory_space<vmem>>, %arg4: memref<1x256xf32, #tpu.memory_space<vmem>>, %arg5: memref<256x128xbf16, #tpu.memory_space<vmem>>, %arg6: memref<1x128xf32, #tpu.memory_space<vmem>>, %arg7: memref<1x128xf32, #tpu.memory_space<vmem>>, %arg8: memref<8x128xf32, #tpu.memory_space<vmem>>) attributes {dimension_semantics = [#tpu.dimension_semantics<parallel>, #tpu.dimension_semantics<arbitrary>], iteration_bounds = array<i64: 2, 1>, scalar_prefetch = 0 : i64, scratch_operands = 0 : i64, tpu.core_type = #tpu.core_type<tc>, window_params = [{transform_indices = @transform_0, window_bounds = array<i64: 8, 128>}, {transform_indices = @transform_1, window_bounds = array<i64: 128, 256>}, {transform_indices = @transform_2, window_bounds = array<i64: 1, 256>}, {transform_indices = @transform_3, window_bounds = array<i64: 256, 128>}, {pipeline_mode = #tpu.pipeline_mode<synchronous>, transform_indices = @transform_4, window_bounds = array<i64: 1, 128>}, {pipeline_mode = #tpu.pipeline_mode<synchronous>, transform_indices = @transform_5, window_bounds = array<i64: 1, 128>}, {transform_indices = @transform_6, window_bounds = array<i64: 8, 128>}]} {
    %c0 = arith.constant 0 : index
    %c0_0 = arith.constant 0 : index
    %0 = vector.load %arg2[%c0, %c0_0] : memref<8x128xbf16, #tpu.memory_space<vmem>>, vector<8x128xbf16>
    %c0_1 = arith.constant 0 : index
    %c0_2 = arith.constant 0 : index
    %1 = vector.load %arg3[%c0_1, %c0_2] : memref<128x256xbf16, #tpu.memory_space<vmem>>, vector<128x256xbf16>
    %cst = arith.constant dense<0.000000e+00> : vector<8x256xf32>
    %2 = tpu.matmul %0, %1, %cst {dimension_numbers = #tpu.dot_dimension_numbers<[1], [0], [0], [1], [0, 0, 1, 1], [], []>} : vector<8x128xbf16>, vector<128x256xbf16>, vector<8x256xf32> -> vector<8x256xf32>
    %c0_3 = arith.constant 0 : index
    %c0_4 = arith.constant 0 : index
    %3 = vector.load %arg4[%c0_3, %c0_4] : memref<1x256xf32, #tpu.memory_space<vmem>>, vector<1x256xf32>
    %4 = vector.broadcast %3 : vector<1x256xf32> to vector<8x256xf32>
    %5 = arith.addf %2, %4 : vector<8x256xf32>
    %cst_5 = arith.constant 0.000000e+00 : f32
    %6 = vector.broadcast %cst_5 : f32 to vector<8x256xf32>
    %7 = arith.maximumf %5, %6 : vector<8x256xf32>
    %8 = arith.truncf %7 : vector<8x256xf32> to vector<8x256xbf16>
    %c0_6 = arith.constant 0 : index
    %c0_7 = arith.constant 0 : index
    %9 = vector.load %arg5[%c0_6, %c0_7] : memref<256x128xbf16, #tpu.memory_space<vmem>>, vector<256x128xbf16>
    %cst_8 = arith.constant dense<0.000000e+00> : vector<8x128xf32>
    %10 = tpu.matmul %8, %9, %cst_8 {dimension_numbers = #tpu.dot_dimension_numbers<[1], [0], [0], [1], [0, 0, 1, 1], [], []>} : vector<8x256xbf16>, vector<256x128xbf16>, vector<8x128xf32> -> vector<8x128xf32>
    %c0_9 = arith.constant 0 : index
    %c0_10 = arith.constant 0 : index
    %11 = vector.load %arg6[%c0_9, %c0_10] : memref<1x128xf32, #tpu.memory_space<vmem>>, vector<1x128xf32>
    %12 = vector.broadcast %11 : vector<1x128xf32> to vector<8x128xf32>
    %13 = arith.addf %10, %12 : vector<8x128xf32>
    %c0_11 = arith.constant 0 : index
    %c0_12 = arith.constant 0 : index
    %14 = vector.load %arg7[%c0_11, %c0_12] : memref<1x128xf32, #tpu.memory_space<vmem>>, vector<1x128xf32>
    %15 = vector.broadcast %14 : vector<1x128xf32> to vector<8x128xf32>
    %16 = arith.mulf %13, %15 : vector<8x128xf32>
    %17 = arith.extf %0 : vector<8x128xbf16> to vector<8x128xf32>
    %18 = arith.addf %16, %17 : vector<8x128xf32>
    %c0_13 = arith.constant 0 : index
    %c0_14 = arith.constant 0 : index
    %19 = vector.load %arg8[%c0_13, %c0_14] : memref<8x128xf32, #tpu.memory_space<vmem>>, vector<8x128xf32>
    tpu.vector_store %arg8[%c0_13, %c0_14], %18 {strides = array<i32>} : memref<8x128xf32, #tpu.memory_space<vmem>>, vector<8x128xf32>,
    return
  }
  func.func @transform_0(%arg0: i32, %arg1: i32) -> (i32, i32) {
    %c0_i32 = arith.constant 0 : i32
    %c0_i32_0 = arith.constant 0 : i32
    return %arg0, %c0_i32 : i32, i32
  }
  func.func @transform_1(%arg0: i32, %arg1: i32) -> (i32, i32) {
    %c0_i32 = arith.constant 0 : i32
    %c0_i32_0 = arith.constant 0 : i32
    return %c0_i32, %arg1 : i32, i32
  }
  func.func @transform_2(%arg0: i32, %arg1: i32) -> (i32, i32) {
    %c0_i32 = arith.constant 0 : i32
    %c0_i32_0 = arith.constant 0 : i32
    return %c0_i32, %arg1 : i32, i32
  }
  func.func @transform_3(%arg0: i32, %arg1: i32) -> (i32, i32) {
    %c0_i32 = arith.constant 0 : i32
    %c0_i32_0 = arith.constant 0 : i32
    return %arg1, %c0_i32 : i32, i32
  }
  func.func @transform_4(%arg0: i32, %arg1: i32) -> (i32, i32) {
    %c0_i32 = arith.constant 0 : i32
    %c0_i32_0 = arith.constant 0 : i32
    %c0_i32_1 = arith.constant 0 : i32
    return %c0_i32, %c0_i32_0 : i32, i32
  }
  func.func @transform_5(%arg0: i32, %arg1: i32) -> (i32, i32) {
    %c0_i32 = arith.constant 0 : i32
    %c0_i32_0 = arith.constant 0 : i32
    %c0_i32_1 = arith.constant 0 : i32
    return %c0_i32, %c0_i32_0 : i32, i32
  }
  func.func @transform_6(%arg0: i32, %arg1: i32) -> (i32, i32) {
    %c0_i32 = arith.constant 0 : i32
    %c0_i32_0 = arith.constant 0 : i32
    return %arg0, %c0_i32 : i32, i32
  }
}

</mosaic_0001>

<bundles_post_ra>
// kernel: ffn_pallas.1
= control target key start
LH: loop header
LB: loop body
LE: loop exit
PB: predicated region body
PF: predicated region fallthrough
CT: control target
= control target key end

     0   :  { %11 = vsyncpa [#allocation3], 0  ;;  %s1342_s0 = inlined_call_operand.vmem [shape: bf16[16,128], index: 0, kind: input, shape index: {}]   ;;  %s1343_s1 = inlined_call_operand.vmem [shape: bf16[128,256], index: 1, kind: input, shape index: {}]   ;;  %s1344_s2 = inlined_call_operand.vmem [shape: f32[1,256], index: 2, kind: input, shape index: {}]   ;;  %s1345_s3 = inlined_call_operand.vmem [shape: bf16[256,128], index: 3, kind: input, shape index: {}]   ;;  %s1346_s4 = inlined_call_operand.vmem [shape: f32[1,128], index: 4, kind: input, shape index: {}]   ;;  %s1347_s5 = inlined_call_operand.vmem [shape: f32[1,128], index: 5, kind: input, shape index: {}]   ;;  %s1348_s6 = inlined_call_operand.hbm [shape: f32[16,128], index: 6, kind: output, shape index: {}]  }
   0x1   :  { %13 = vsyncpa [#allocation3 + $0x1], 0  ;;  %s1092_s21 = smov 0   ;;  %s1094_s22 = smov 0  }
   0x2   :  { %s1096_s23 = smov 0   ;;  %s1098_s24 = smov 0  }
   0x3   :  { %s1100_s25 = smov 0   ;;  %s1102_s26 = smov 0  }
   0x4 LB: > { %s746_s27 = sadd.s32 4294967295, %s1055_s26   ;;  %s747_s28 = sadd.s32 4294967294, %s1055_s26   ;;  %s1055_s26 = sphi %s1102_s26, %s19_s26   ;;  %s1051_s25 = sphi %s1100_s25, %s1355_s25   ;;  %s1047_s24 = sphi %s1098_s24, %s1354_s24   ;;  %s1043_s23 = sphi %s1096_s23, %s1353_s23   ;;  %s1039_s22 = sphi %s1094_s22, %s1352_s22   ;;  %s1035_s21 = sphi %s1092_s21, %s1351_s21  }
   0x5   : > { %s31_s29 = sadd.s32 1, %s1051_s25  ;;  %s184_s30 = sadd.s32 1, %s1043_s23 }
   0x6   : > { %p33_p0 = scmp.ge.s32.totalorder %s31_s29, 2  ;;  %p194_p1 = scmp.ne.s32.totalorder %s1043_s23, %s1039_s22 }
   0x7   : > { %p195_p2 = scmp.eq.s32.totalorder %s746_s27, 1  ;;  %p200_p3 = scmp.ne.s32.totalorder %s1039_s22, %s1035_s21 }
   0x8   : > { %s1357_s29 = smov (%p33_p0, %s31_s29), 0  ;;  %p201_p5 = scmp.eq.s32.totalorder %s747_s28, 1 }
   0x9   : > { %p1132_p4 = por %p195_p2, %p194_p1  ;;  %s181_s8 = ssub.s32 %s1051_s25, %s1357_s29 }
   0xa   : > { %p753_p6 = scmp.ge.s32.totalorder %s1055_s26, 1  ;;  %p182_p7 = scmp.eq.s32.totalorder %s181_s8, 0 }
   0xb   : > { %p1139_p8 = por %p201_p5, %p200_p3  ;;  %p258_p9 = scmp.lt.s32.totalorder %s1055_s26, 3 }
   0xc   : > { %s1145_s10 = scalar_select %p182_p7, %s1043_s23, %s184_s30  }
   0xd   : > { %p259_p10 = pnand %p753_p6, %p258_p9 }
   0xe   : > { %p301_p11 = scmp.lt.s32.totalorder (!%p259_p10), %s1047_s24, 1  ;;  %s298_s17 = sand.u32 (!%p259_p10), 1, %s1039_s22  }
   0xf   : > { %262 = sbr.rel (%p259_p10) target bundleno = 329 (0x149), region = 44  ;;  %s754_s19 = sshll.u32 (!%p259_p10), %s298_s17, 3 }
  0x10   : > { %s885_s20 = sshll.u32 (!%p259_p10), %s1047_s24, 3  ;;  %s300_s13 = scalar_lea.vmem (!%p259_p10), [#allocation2], %s754_s19 }
  0x11   : > { %s632_s12 = scalar_lea.hbm (!%p259_p10), %s1348_s6, %s885_s20  ;;  %s634_s14 = sshll.u32 (!%p259_p10), %s300_s13, 4  ;;  %s635_s14 = int_to_ptr.vmem [resolvable:$true] %s634_s14 }
  0x12   : > { %s636_s15 = sshll.u32 (!%p259_p10), %s632_s12, 4  ;;  %s997_s19 = scalar_lea.hbm (!%p259_p10), %s1348_s6, 16  ;;  %s637_s15 = int_to_ptr.hbm [resolvable:$true] %s636_s15 }
  0x14   : > { %v814_v0 = vld [vmem:[%s1343_s1 + $0x70] sm:$0xf]  ;;  %v903_v1 = vld [vmem:[%s1343_s1 + $0x74] sm:$0xf0]  ;;  %v902_v2 = vld [vmem:[%s1343_s1 + $0x74] sm:$0xf] }
  0x15   : > { %v815_v3 = vor.u32 %v903_v1, %v814_v0  ;;  %v816_v4 = vld [vmem:[%s1343_s1 + $0x78] sm:$0xf0]  ;;  %v806_v5 = vld [vmem:[%s1343_s1 + $0x60] sm:$0xf]  ;;  %v901_v6 = vld [vmem:[%s1343_s1 + $0x64] sm:$0xf0] }
  0x16   : > { %v819_v7 = vor.u32 %v902_v2, %v816_v4  ;;  %v900_v8 = vld [vmem:[%s1343_s1 + $0x64] sm:$0xf]  ;;  %v808_v9 = vld [vmem:[%s1343_s1 + $0x68] sm:$0xf0]  ;;  %v807_v10 = vor.u32 %v901_v6, %v806_v5  ;;  %v798_v12 = vld [vmem:[%s1343_s1 + $0x50] sm:$0xf] }
  0x17   : > { %425 = vmatpush.bf16.msra.mxu0 %v815_v3  ;;  %v811_v11 = vor.u32 %v900_v8, %v808_v9  ;;  %v899_v13 = vld [vmem:[%s1343_s1 + $0x54] sm:$0xf0]  ;;  %v898_v14 = vld [vmem:[%s1343_s1 + $0x54] sm:$0xf]  ;;  %v800_v15 = vld [vmem:[%s1343_s1 + $0x58] sm:$0xf0] }
  0x18   : > { %438 = vmatpush.bf16.msra.mxu1 %v819_v7  ;;  %v799_v16 = vor.u32 %v899_v13, %v798_v12  ;;  %v803_v17 = vor.u32 %v898_v14, %v800_v15  ;;  %v790_v18 = vld [vmem:[%s1343_s1 + $0x40] sm:$0xf]  ;;  %v897_v19 = vld [vmem:[%s1343_s1 + $0x44] sm:$0xf0]  ;;  %v896_v20 = vld [vmem:[%s1343_s1 + $0x44] sm:$0xf] }
  0x19   : > { %v792_v21 = vld [vmem:[%s1343_s1 + $0x48] sm:$0xf0]  ;;  %v911_v22 = vld [vmem:[%s1345_s3 + $0x38] sm:$0xff]  ;;  %v791_v23 = vor.u32 %v897_v19, %v790_v18  ;;  %v782_v26 = vld [vmem:[%s1343_s1 + $0x30] sm:$0xf]  ;;  %s302_s11 = scalar_select %p301_p11, %s1047_s24, 1 }
  0x1a   : > { %v919_v24 = vld [vmem:[%s1345_s3 + $0x78] sm:$0xff]  ;;  %v795_v25 = vor.u32 %v896_v20, %v792_v21  ;;  %587 = vmatpush.bf16.msra.mxu2 %v911_v22  ;;  %v910_v28 = vld [vmem:[%s1345_s3 + $0x30] sm:$0xff]  ;;  %v774_v34 = vld [vmem:[%s1343_s1 + $0x20] sm:$0xf]  ;;  %s622_s24 = scalar_lea.sflag [#allocation3], %s298_s17 }
  0x1b   : > { %426 = vmatpush.bf16.msra.mxu0 %v807_v10  ;;  %v895_v27 = vld [vmem:[%s1343_s1 + $0x34] sm:$0xf0]  ;;  %v894_v29 = vld [vmem:[%s1343_s1 + $0x34] sm:$0xf]  ;;  %v784_v30 = vld [vmem:[%s1343_s1 + $0x38] sm:$0xf0]  ;;  %600 = vmatpush.bf16.msra.mxu3 %v919_v24 }
  0x1c   : > { %439 = vmatpush.bf16.msra.mxu1 %v811_v11  ;;  %v918_v31 = vld [vmem:[%s1345_s3 + $0x70] sm:$0xff]  ;;  %v783_v32 = vor.u32 %v895_v27, %v782_v26  ;;  %v787_v33 = vor.u32 %v894_v29, %v784_v30  ;;  %v893_v35 = vld [vmem:[%s1343_s1 + $0x24] sm:$0xf0]  ;;  %v892_v37 = vld [vmem:[%s1343_s1 + $0x24] sm:$0xf]  ;;  %s755_s8 = sshll.u32 %s302_s11, 2 }
  0x1d   : > { %v909_v36 = vld [vmem:[%s1345_s3 + $0x28] sm:$0xff]  ;;  %v775_v40 = vor.u32 %v893_v35, %v774_v34  ;;  %v766_v42 = vld [vmem:[%s1343_s1 + $0x10] sm:$0xf]  ;;  %v891_v43 = vld [vmem:[%s1343_s1 + $0x14] sm:$0xf0]  ;;  %s304_s16 = scalar_lea.vmem %s1342_s0, %s755_s8 }
  0x1e   : > { %588 = vmatpush.bf16.msra.mxu2 %v910_v28  ;;  %v776_v38 = vld [vmem:[%s1343_s1 + $0x28] sm:$0xf0]  ;;  %v908_v44 = vld [vmem:[%s1345_s3 + $0x20] sm:$0xff]  ;;  %v890_v45 = vld [vmem:[%s1343_s1 + $0x14] sm:$0xf]  ;;  %v767_v48 = vor.u32 %v891_v43, %v766_v42 }
  0x1f   : > { %427 = vmatpush.bf16.msra.mxu0 %v799_v16  ;;  %601 = vmatpush.bf16.msra.mxu3 %v918_v31  ;;  %v917_v39 = vld [vmem:[%s1345_s3 + $0x68] sm:$0xff]  ;;  %v779_v41 = vor.u32 %v892_v37, %v776_v38  ;;  %v768_v46 = vld [vmem:[%s1343_s1 + $0x18] sm:$0xf0]  ;;  %v916_v47 = vld [vmem:[%s1345_s3 + $0x60] sm:$0xff] }
  0x20   : > { %440 = vmatpush.bf16.msra.mxu1 %v803_v17  ;;  %v771_v49 = vor.u32 %v890_v45, %v768_v46  ;;  %v758_v50 = vld [vmem:[%s1343_s1] sm:$0xf]  ;;  %v889_v51 = vld [vmem:[%s1343_s1 + $0x4] sm:$0xf0]  ;;  %v907_v52 = vld [vmem:[%s1345_s3 + $0x18] sm:$0xff] }
  0x21   : > { %v888_v53 = vld [vmem:[%s1343_s1 + $0x4] sm:$0xf]  ;;  %v760_v54 = vld [vmem:[%s1343_s1 + $0x8] sm:$0xf0]  ;;  %v915_v55 = vld [vmem:[%s1345_s3 + $0x58] sm:$0xff]  ;;  %v759_v56 = vor.u32 %v889_v51, %v758_v50 }
  0x22   : > { %589 = vmatpush.bf16.msra.mxu2 %v909_v36  ;;  %v763_v57 = vor.u32 %v888_v53, %v760_v54  ;;  %v906_v58 = vld [vmem:[%s1345_s3 + $0x10] sm:$0xff]  ;;  %v322_v60 = vld [vmem:[%s304_s16] sm:$0xf]  ;;  %v905_v61 = vld [vmem:[%s1345_s3 + $0x8] sm:$0xff]  ;;  %s991_s16 = sshra.s32 %s637_s15, 4  ;;  %s992_s16 = int_to_ptr.hbm [resolvable:$true] %s991_s16 }
  0x23   : > { %428 = vmatpush.bf16.msra.mxu0 %v791_v23  ;;  %602 = vmatpush.bf16.msra.mxu3 %v917_v39  ;;  %v914_v59 = vld [vmem:[%s1345_s3 + $0x50] sm:$0xff]  ;;  %v913_v62 = vld [vmem:[%s1345_s3 + $0x48] sm:$0xff]  ;;  %v904_v63 = vld [vmem:[%s1345_s3] sm:$0xff]  ;;  %v618_v19 = vunpack.c.l.bf16 %v322_v60  ;;  %s993_s18 = scalar_lea.hbm %s992_s16, 8  ;;  %p998_p1 = scmp.lt.s32.totalorder %s992_s16, %s1348_s6 }
  0x24   : > { %441 = vmatpush.bf16.msra.mxu1 %v795_v25  ;;  %v912_v0 = vld [vmem:[%s1345_s3 + $0x40] sm:$0xff]  ;;  %p994_p12 = scmp.ne.s32.totalorder %s992_s16, %s993_s18  ;;  %p999_p2 = scmp.lt.s32.totalorder %s997_s19, %s993_s18 }
  0x25   : > { %v339_v1 = vld [vmem:[%s1344_s2] sm:$0x3] }
  0x26   : > { %590 = vmatpush.bf16.msra.mxu2 %v908_v44  ;;  %v341_v2 = vperm.slane %v339_v1, 0  ;;  %v342_v3 = vperm.slane %v339_v1, 1  ;;  %v975_v14 = vld [vmem:[%s1346_s4] ss:$0 sm:$0xff]  ;;  %p995_p13 = pnand %p994_p12, %p1132_p4  ;;  %p1000_p3 = por %p999_p2, %p998_p1 }
  0x27   : > { %429 = vmatpush.bf16.msra.mxu0 %v783_v32  ;;  %603 = vmatpush.bf16.msra.mxu3 %v916_v47  ;;  %v976_v18 = vld [vmem:[%s1347_s5] ss:$0 sm:$0xff] }
  0x28   : > { %442 = vmatpush.bf16.msra.mxu1 %v787_v33  ;;  %p996_p0 = pneg %p995_p13 }
  0x2a   : > { %591 = vmatpush.bf16.msra.mxu2 %v907_v52  ;;  %p1001_p5 = pnand %p1000_p3, %p996_p0 }
  0x2b   : > { %430 = vmatpush.bf16.msra.mxu0 %v775_v40  ;;  %604 = vmatpush.bf16.msra.mxu3 %v915_v55 }
  0x2c   : > { %443 = vmatpush.bf16.msra.mxu1 %v779_v41 }
  0x2e   : > { %592 = vmatpush.bf16.msra.mxu2 %v906_v58 }
  0x2f   : > { %431 = vmatpush.bf16.msra.mxu0 %v767_v48  ;;  %605 = vmatpush.bf16.msra.mxu3 %v914_v59 }
  0x30   : > { %444 = vmatpush.bf16.msra.mxu1 %v771_v49 }
  0x32   : > { %593 = vmatpush.bf16.msra.mxu2 %v905_v61 }
  0x33   : > { %432 = vmatpush.bf16.msra.mxu0 %v759_v56  ;;  %606 = vmatpush.bf16.msra.mxu3 %v913_v62 }
  0x34   : > { %445 = vmatpush.bf16.msra.mxu1 %v763_v57 }
  0x36   : > { %433 = vmatmul.bf16.vlgmr.msra.gmra.mxu0 %v322_v60  ;;  %594 = vmatpush.bf16.msra.mxu2 %v904_v63 }
  0x37   : > { %446 = vmatmul.bf16.vlgmr.msra.gmra.mxu1 %v322_v60  ;;  %607 = vmatpush.bf16.msra.mxu3 %v912_v0 }
  0xb3   : > { %v434_v4 = vpop.f32.mrf.mxu0 }
  0xb4   : > { %v435_v5 = vadd.f32 %v434_v4, %v341_v2  ;;  %v447_v6 = vpop.f32.mrf.mxu1 }
  0xb5   : > { %v448_v7 = vadd.f32 %v447_v6, %v342_v3 }
  0xb6   : > { %v451_v8 = vmax.f32 %v435_v5, 0.0 }
  0xb7   : > { %v452_v9 = vmax.f32 %v448_v7, 0.0 }
  0xb8   : > { %v453_v10 = vpack.c.bf16 %v451_v8, %v451_v8 }
  0xb9   : > { %v454_v11 = vpack.c.bf16 %v452_v9, %v452_v9 }
  0xba   : > { %595 = vmatmul.bf16.vlgmr.msra.gmra.mxu2 %v453_v10 }
  0xbb   : > { %608 = vmatmul.bf16.vlgmr.msra.gmra.mxu3 %v454_v11  ;;  %v436_v12 = vpop.f32.mrf.mxu0 }
  0xbc   : > { %v449_v13 = vpop.f32.mrf.mxu1 }
 0x13d   : > { %v596_v15 = vpop.f32.mrf.mxu2 }
 0x13e   : > { %v597_v16 = vadd.f32 %v975_v14, %v596_v15  ;;  %v609_v17 = vpop.f32.mrf.mxu3 }
 0x140   : > { %v610_v20 = vadd.f32 %v609_v17, %v597_v16 }
 0x142   : > { %v617_v21 = vmul.f32 %v976_v18, %v610_v20 }
 0x144   : > { %v619_v22 = vadd.f32 %v618_v19, %v617_v21 }
 0x145   : > { %v598_v23 = vpop.f32.mrf.mxu2 }
 0x146   : > { %v611_v24 = vpop.f32.mrf.mxu3  ;;  %620 = vst [vmem:[%s300_s13] sm:$0xff] %v619_v22 }
 0x147   : > { %1004 = shalt.err (!%p1001_p5)
}
 0x148   : > { %920 = dma.vmem_to_hbm [thread:$0]  (%p1132_p4), %s635_s14, 128, %s637_s15, %s622_s24  }
 0x149 PF: > { %p926_p6 = scmp.ge.s32.totalorder %s1055_s26, 2  ;;  %s648_s17 = sand.u32 1, %s1035_s21  }
 0x14a   : > { %s649_s30 = scalar_lea.sflag [#allocation3], %s648_s17 }
 0x14b   : > { %p923_p7 = pnand %p926_p6, %p1139_p8 }
 0x14d   : > { %p924_p9 = pneg %p923_p7 }
 0x14f   : > { %1030 = dma.done.wait (%p924_p9), %s649_s30, 128  }
 0x150   : > { %1032 = vsyncadd (%p924_p9), %s649_s30, 4294967168  ;;  %s19_s26 = sadd.s32 1, %s1055_s26   ;;  %s1351_s21 = smov %s1039_s22 }
 0x151   : > { %p16_p10 = scmp.ge.s32.totalorder %s19_s26, 4   ;;  %s1352_s22 = smov %s1043_s23 }
 0x152   : > { %s1353_s23 = smov %s1145_s10  ;;  %s1354_s24 = smov %s1051_s25 }
 0x153   : > { %s1355_s25 = smov %s1357_s29  ;;  %18 = sbr.rel (!%p16_p10) target bundleno = 4 (0x4), region = 88 }
 0x158   :  { %655 = vsyncpa [#allocation3], 1 }
 0x159   :  { %657 = vsyncpa [#allocation3 + $0x1], 1 }

</bundles_post_ra>
